<compile_context>
chip_gen: v5e
topology: v5e:2x2
jax: 0.10.0
libtpu: 0.0.40
codegen_flags: <defaults>
</compile_context>

<pallas_src>
import functools

import jax
import jax.numpy as jnp
from jax.experimental import pallas as pl
from jax.experimental.pallas import tpu as pltpu


def _fused_3conv_kernel(x_ref, w_ref, b_ref, o_ref, prow_ref, *, nb, h):
    """op3(op2(op1(x))) with the activation resident in VMEM.

    x_ref:    (nb*h, WC)       lane-dense stacked rows of nb images
    w_ref:    (3, 3*WC, WC)    pre-lowered (Toeplitz) GEMM weights, one per op
    b_ref:    (3, 1, WC)       biases tiled over width
    o_ref:    (nb*h, WC)       lane-dense output slab
    prow_ref: VMEM (nb*h, 3*WC) per-output-row [row-1 | row | row+1] window, f32
    """
    WC = x_ref.shape[-1]

    # Only the per-image halo sub-rows need zeros (the scatter below never
    # overwrites them); write those 2*nb rows once instead of the whole buffer.
    zrow = jnp.zeros((1, WC), jnp.float32)
    for n in range(nb):
        prow_ref[n * h:n * h + 1, 0:WC] = zrow                        # top halo
        prow_ref[(n + 1) * h - 1:(n + 1) * h, 2 * WC:3 * WC] = zrow   # bottom halo

    def scatter(act):
        # Write the activation straight into prow's three column slabs at the
        # vertically shifted row positions (no intermediate halo buffer).
        for n in range(nb):
            base = n * h
            img = act[base:base + h]
            prow_ref[base + 1:base + h, 0:WC] = img[:h - 1]        # row h-1 slab
            prow_ref[base:base + h, WC:2 * WC] = img               # row h   slab
            prow_ref[base:base + h - 1, 2 * WC:3 * WC] = img[1:]   # row h+1 slab

    scatter(x_ref[...].astype(jnp.float32))
    act = None
    for layer in range(3):                  # op1 -> op2 -> op3, unrolled
        if layer:
            scatter(act)                    # feed previous op's output back in
        # One MXU matmul per conv: (nb*h, 3*WC) x (3*WC, WC) + bias.
        act = (jnp.dot(prow_ref[...], w_ref[layer],
                       preferred_element_type=jnp.float32)
               + b_ref[layer])
    o_ref[...] = act.astype(o_ref.dtype)


def _lower_conv3x3_weight(w, width):
    """Lower a (3, 3, Cin, Cout) same-padding conv weight to a dense GEMM.

    Returns W_big of shape (3*width*Cin, width*Cout) such that
        out[h, w*Cout+co] = sum_j prow[h, j] * W_big[j, w*Cout+co]
    where prow[h] = concat(x[h-1], x[h], x[h+1]) flattened as (width*Cin,)
    (zero rows outside the image).  Horizontal padding is implicit in the
    banded zero structure of W_big.
    """
    KH, KW, Cin, Cout = w.shape
    u = jnp.arange(width)                       # input column
    wcol = jnp.arange(width)                    # output column
    kw = jnp.arange(KW)
    # mask[kw, u, wcol] = 1 iff u == wcol + kw - 1  (pad=1 cross-correlation)
    mask = (u[None, :, None] == (wcol[None, None, :] + kw[:, None, None] - 1))
    big = jnp.einsum('kuw,hkio->huiwo', mask.astype(w.dtype), w)
    return big.reshape(KH * width * Cin, width * Cout)


def _fused_searchable_layer(x, w_big, b_big, *, grid_n=1):
    """x: (N, H, W*C); w_big: (3, 3*W*C, W*C); b_big: (3, 1, W*C)."""
    N, H, WC = x.shape
    K = w_big.shape[1]
    assert N % grid_n == 0, (N, grid_n)
    nb = N // grid_n
    x2d = x.reshape(N * H, WC)                  # lane-dense 2D slab
    kernel = functools.partial(_fused_3conv_kernel, nb=nb, h=H)
    flops = 2 * 3 * N * H * K * WC
    bytes_accessed = 4 * (2 * N * H * WC + w_big.size + b_big.size)
    y2d = pl.pallas_call(
        kernel,
        out_shape=jax.ShapeDtypeStruct((N * H, WC), x.dtype),
        grid=(grid_n,),
        in_specs=[
            pl.BlockSpec((nb * H, WC), lambda n: (n, 0)),
            pl.BlockSpec((3, K, WC), lambda n: (0, 0, 0)),   # resident weights
            pl.BlockSpec((3, 1, WC), lambda n: (0, 0, 0)),   # resident bias
        ],
        out_specs=pl.BlockSpec((nb * H, WC), lambda n: (n, 0)),
        scratch_shapes=[
            pltpu.VMEM((nb * H, 3 * WC), jnp.float32),   # stacked 3-row windows
        ],
        compiler_params=pltpu.CompilerParams(
            dimension_semantics=("parallel",)),
        cost_estimate=pl.CostEstimate(
            flops=flops, transcendentals=0, bytes_accessed=bytes_accessed),
    )(x2d, w_big, b_big)
    return y2d.reshape(N, H, WC)


def init_searchable_layer_params(key, channels):
    """Deterministic params for op1/op2/op3 (each a Conv2d(C, C, 3, pad=1))."""
    params = []
    for i in range(3):
        kw_key, kb_key = jax.random.split(jax.random.fold_in(key, i))
        w = jax.random.normal(kw_key, (3, 3, channels, channels),
                              jnp.float32) * 0.1
        b = jax.random.normal(kb_key, (channels,), jnp.float32) * 0.01
        params.append((w, b))
    return params


def lower_searchable_layer_params(params, width):
    """One-time lowering to GEMM form — hoisted out of the per-call forward."""
    w_big = jnp.stack([_lower_conv3x3_weight(w, width) for (w, _) in params])
    b_big = jnp.stack([jnp.tile(b, width)[None, :] for (_, b) in params])
    return w_big, b_big


@functools.partial(jax.jit, static_argnames=("grid_n",))
def searchable_layer_forward(x_nchw, w_big, b_big, grid_n=1):
    """Forward pass of SearchableLayer: x -> op1 -> op2 -> op3.

    x_nchw: (N, C, H, W) float32 (PyTorch layout). Returns (N, C, H, W).
    w_big/b_big: pre-lowered params from lower_searchable_layer_params.
    grid_n: number of batch blocks (1 for single-TC v5e/v6e; 2 on v7x to give
    each TensorCore one batch-half).
    """
    N, C, H, W = x_nchw.shape
    # NCHW -> lane-dense (N, H, W*C) slab for the kernel.
    x = jnp.transpose(x_nchw, (0, 2, 3, 1)).reshape(N, H, W * C)
    y = _fused_searchable_layer(x, w_big, b_big, grid_n=grid_n)
    # Back to the PyTorch NCHW convention.
    return jnp.transpose(y.reshape(N, H, W, C), (0, 3, 1, 2))


if __name__ == "__main__":
    key = jax.random.PRNGKey(0)
    x_key, p_key = jax.random.split(key)

    N, C, H, W = 2, 8, 16, 16          # W*C = 128 -> perfectly lane-dense
    x = jax.random.normal(x_key, (N, C, H, W), jnp.float32)
    params = init_searchable_layer_params(p_key, C)
    # Weight lowering done once, outside the jitted forward (perf review item).
    w_big, b_big = lower_searchable_layer_params(params, W)

    out = jax.block_until_ready(searchable_layer_forward(x, w_big, b_big))

    assert out.shape == (N, C, H, W), out.shape
    assert out.dtype == jnp.float32
    assert bool(jnp.all(jnp.isfinite(out)))

    # Pure-JAX reference: three Conv2d(C, C, 3, padding=1, bias=True) in sequence.
    ref = jnp.transpose(x, (0, 2, 3, 1))
    for (w, b) in params:
        ref = jax.lax.conv_general_dilated(
            ref, w, window_strides=(1, 1), padding="SAME",
            dimension_numbers=("NHWC", "HWIO", "NHWC")) + b
    ref = jnp.transpose(ref, (0, 3, 1, 2))
    assert bool(jnp.allclose(out, ref, rtol=1e-3, atol=1e-3)), \
        float(jnp.max(jnp.abs(out - ref)))

    print("KERNEL_OK")
</pallas_src>

<mosaic_0001>
module attributes {stable_mosaic.version = 11 : i64} {
  func.func @_fused_3conv_kernel(%arg0: i32, %arg1: memref<32x128xf32, #tpu.memory_space<vmem>>, %arg2: memref<3x384x128xf32, #tpu.memory_space<vmem>>, %arg3: memref<3x1x128xf32, #tpu.memory_space<vmem>>, %arg4: memref<32x128xf32, #tpu.memory_space<vmem>>, %arg5: memref<32x384xf32, #tpu.memory_space<vmem>>) attributes {dimension_semantics = [#tpu.dimension_semantics<parallel>], iteration_bounds = array<i64: 1>, scalar_prefetch = 0 : i64, scratch_operands = 1 : i64, tpu.core_type = #tpu.core_type<tc>, window_params = [{transform_indices = @transform_0, window_bounds = array<i64: 32, 128>}, {pipeline_mode = #tpu.pipeline_mode<synchronous>, transform_indices = @transform_1, window_bounds = array<i64: 3, 384, 128>}, {pipeline_mode = #tpu.pipeline_mode<synchronous>, transform_indices = @transform_2, window_bounds = array<i64: 3, 1, 128>}, {transform_indices = @transform_3, window_bounds = array<i64: 32, 128>}]} {
    %cst = arith.constant 0.000000e+00 : f32
    %0 = vector.broadcast %cst : f32 to vector<1x128xf32>
    %c0 = arith.constant 0 : index
    %c0_0 = arith.constant 0 : index
    %1 = vector.load %arg5[%c0, %c0_0] : memref<32x384xf32, #tpu.memory_space<vmem>>, vector<1x128xf32>
    tpu.vector_store %arg5[%c0, %c0_0], %0 {strides = array<i32>} : memref<32x384xf32, #tpu.memory_space<vmem>>, vector<1x128xf32>,
    %c15 = arith.constant 15 : index
    %c256 = arith.constant 256 : index
    %2 = vector.load %arg5[%c15, %c256] : memref<32x384xf32, #tpu.memory_space<vmem>>, vector<1x128xf32>
    tpu.vector_store %arg5[%c15, %c256], %0 {strides = array<i32>} : memref<32x384xf32, #tpu.memory_space<vmem>>, vector<1x128xf32>,
    %c16 = arith.constant 16 : index
    %c0_1 = arith.constant 0 : index
    %3 = vector.load %arg5[%c16, %c0_1] : memref<32x384xf32, #tpu.memory_space<vmem>>, vector<1x128xf32>
    tpu.vector_store %arg5[%c16, %c0_1], %0 {strides = array<i32>} : memref<32x384xf32, #tpu.memory_space<vmem>>, vector<1x128xf32>,
    %c31 = arith.constant 31 : index
    %c256_2 = arith.constant 256 : index
    %4 = vector.load %arg5[%c31, %c256_2] : memref<32x384xf32, #tpu.memory_space<vmem>>, vector<1x128xf32>
    tpu.vector_store %arg5[%c31, %c256_2], %0 {strides = array<i32>} : memref<32x384xf32, #tpu.memory_space<vmem>>, vector<1x128xf32>,
    %c0_3 = arith.constant 0 : index
    %c0_4 = arith.constant 0 : index
    %5 = vector.load %arg1[%c0_3, %c0_4] : memref<32x128xf32, #tpu.memory_space<vmem>>, vector<32x128xf32>
    %6 = vector.extract_strided_slice %5 {offsets = [0, 0], sizes = [16, 128], strides = [1, 1]} : vector<32x128xf32> to vector<16x128xf32>
    %7 = vector.extract_strided_slice %6 {offsets = [0, 0], sizes = [15, 128], strides = [1, 1]} : vector<16x128xf32> to vector<15x128xf32>
    %c1 = arith.constant 1 : index
    %c0_5 = arith.constant 0 : index
    %8 = vector.load %arg5[%c1, %c0_5] : memref<32x384xf32, #tpu.memory_space<vmem>>, vector<15x128xf32>
    tpu.vector_store %arg5[%c1, %c0_5], %7 {strides = array<i32>} : memref<32x384xf32, #tpu.memory_space<vmem>>, vector<15x128xf32>,
    %c0_6 = arith.constant 0 : index
    %c128 = arith.constant 128 : index
    %9 = vector.load %arg5[%c0_6, %c128] : memref<32x384xf32, #tpu.memory_space<vmem>>, vector<16x128xf32>
    tpu.vector_store %arg5[%c0_6, %c128], %6 {strides = array<i32>} : memref<32x384xf32, #tpu.memory_space<vmem>>, vector<16x128xf32>,
    %10 = vector.extract_strided_slice %6 {offsets = [1, 0], sizes = [15, 128], strides = [1, 1]} : vector<16x128xf32> to vector<15x128xf32>
    %c0_7 = arith.constant 0 : index
    %c256_8 = arith.constant 256 : index
    %11 = vector.load %arg5[%c0_7, %c256_8] : memref<32x384xf32, #tpu.memory_space<vmem>>, vector<15x128xf32>
    tpu.vector_store %arg5[%c0_7, %c256_8], %10 {strides = array<i32>} : memref<32x384xf32, #tpu.memory_space<vmem>>, vector<15x128xf32>,
    %12 = vector.extract_strided_slice %5 {offsets = [16, 0], sizes = [16, 128], strides = [1, 1]} : vector<32x128xf32> to vector<16x128xf32>
    %13 = vector.extract_strided_slice %12 {offsets = [0, 0], sizes = [15, 128], strides = [1, 1]} : vector<16x128xf32> to vector<15x128xf32>
    %c17 = arith.constant 17 : index
    %c0_9 = arith.constant 0 : index
    %14 = vector.load %arg5[%c17, %c0_9] : memref<32x384xf32, #tpu.memory_space<vmem>>, vector<15x128xf32>
    tpu.vector_store %arg5[%c17, %c0_9], %13 {strides = array<i32>} : memref<32x384xf32, #tpu.memory_space<vmem>>, vector<15x128xf32>,
    %c16_10 = arith.constant 16 : index
    %c128_11 = arith.constant 128 : index
    %15 = vector.load %arg5[%c16_10, %c128_11] : memref<32x384xf32, #tpu.memory_space<vmem>>, vector<16x128xf32>
    tpu.vector_store %arg5[%c16_10, %c128_11], %12 {strides = array<i32>} : memref<32x384xf32, #tpu.memory_space<vmem>>, vector<16x128xf32>,
    %16 = vector.extract_strided_slice %12 {offsets = [1, 0], sizes = [15, 128], strides = [1, 1]} : vector<16x128xf32> to vector<15x128xf32>
    %c16_12 = arith.constant 16 : index
    %c256_13 = arith.constant 256 : index
    %17 = vector.load %arg5[%c16_12, %c256_13] : memref<32x384xf32, #tpu.memory_space<vmem>>, vector<15x128xf32>
    tpu.vector_store %arg5[%c16_12, %c256_13], %16 {strides = array<i32>} : memref<32x384xf32, #tpu.memory_space<vmem>>, vector<15x128xf32>,
    %c0_14 = arith.constant 0 : index
    %c0_15 = arith.constant 0 : index
    %18 = vector.load %arg5[%c0_14, %c0_15] : memref<32x384xf32, #tpu.memory_space<vmem>>, vector<32x384xf32>
    %c0_16 = arith.constant 0 : index
    %c0_17 = arith.constant 0 : index
    %c0_18 = arith.constant 0 : index
    %19 = vector.load %arg2[%c0_16, %c0_17, %c0_18] : memref<3x384x128xf32, #tpu.memory_space<vmem>>, vector<1x384x128xf32>
    %20 = vector.shape_cast %19 : vector<1x384x128xf32> to vector<384x128xf32>
    %cst_19 = arith.constant dense<0.000000e+00> : vector<32x128xf32>
    %21 = tpu.matmul %18, %20, %cst_19 {dimension_numbers = #tpu.dot_dimension_numbers<[1], [0], [0], [1], [0, 0, 1, 1], [], []>} : vector<32x384xf32>, vector<384x128xf32>, vector<32x128xf32> -> vector<32x128xf32>
    %c0_20 = arith.constant 0 : index
    %c0_21 = arith.constant 0 : index
    %c0_22 = arith.constant 0 : index
    %22 = vector.load %arg3[%c0_20, %c0_21, %c0_22] : memref<3x1x128xf32, #tpu.memory_space<vmem>>, vector<1x1x128xf32>
    %23 = vector.shape_cast %22 : vector<1x1x128xf32> to vector<1x128xf32>
    %24 = vector.broadcast %23 : vector<1x128xf32> to vector<32x128xf32>
    %25 = arith.addf %21, %24 : vector<32x128xf32>
    %26 = vector.extract_strided_slice %25 {offsets = [0, 0], sizes = [16, 128], strides = [1, 1]} : vector<32x128xf32> to vector<16x128xf32>
    %27 = vector.extract_strided_slice %26 {offsets = [0, 0], sizes = [15, 128], strides = [1, 1]} : vector<16x128xf32> to vector<15x128xf32>
    %c1_23 = arith.constant 1 : index
    %c0_24 = arith.constant 0 : index
    %28 = vector.load %arg5[%c1_23, %c0_24] : memref<32x384xf32, #tpu.memory_space<vmem>>, vector<15x128xf32>
    tpu.vector_store %arg5[%c1_23, %c0_24], %27 {strides = array<i32>} : memref<32x384xf32, #tpu.memory_space<vmem>>, vector<15x128xf32>,
    %c0_25 = arith.constant 0 : index
    %c128_26 = arith.constant 128 : index
    %29 = vector.load %arg5[%c0_25, %c128_26] : memref<32x384xf32, #tpu.memory_space<vmem>>, vector<16x128xf32>
    tpu.vector_store %arg5[%c0_25, %c128_26], %26 {strides = array<i32>} : memref<32x384xf32, #tpu.memory_space<vmem>>, vector<16x128xf32>,
    %30 = vector.extract_strided_slice %26 {offsets = [1, 0], sizes = [15, 128], strides = [1, 1]} : vector<16x128xf32> to vector<15x128xf32>
    %c0_27 = arith.constant 0 : index
    %c256_28 = arith.constant 256 : index
    %31 = vector.load %arg5[%c0_27, %c256_28] : memref<32x384xf32, #tpu.memory_space<vmem>>, vector<15x128xf32>
    tpu.vector_store %arg5[%c0_27, %c256_28], %30 {strides = array<i32>} : memref<32x384xf32, #tpu.memory_space<vmem>>, vector<15x128xf32>,
    %32 = vector.extract_strided_slice %25 {offsets = [16, 0], sizes = [16, 128], strides = [1, 1]} : vector<32x128xf32> to vector<16x128xf32>
    %33 = vector.extract_strided_slice %32 {offsets = [0, 0], sizes = [15, 128], strides = [1, 1]} : vector<16x128xf32> to vector<15x128xf32>
    %c17_29 = arith.constant 17 : index
    %c0_30 = arith.constant 0 : index
    %34 = vector.load %arg5[%c17_29, %c0_30] : memref<32x384xf32, #tpu.memory_space<vmem>>, vector<15x128xf32>
    tpu.vector_store %arg5[%c17_29, %c0_30], %33 {strides = array<i32>} : memref<32x384xf32, #tpu.memory_space<vmem>>, vector<15x128xf32>,
    %c16_31 = arith.constant 16 : index
    %c128_32 = arith.constant 128 : index
    %35 = vector.load %arg5[%c16_31, %c128_32] : memref<32x384xf32, #tpu.memory_space<vmem>>, vector<16x128xf32>
    tpu.vector_store %arg5[%c16_31, %c128_32], %32 {strides = array<i32>} : memref<32x384xf32, #tpu.memory_space<vmem>>, vector<16x128xf32>,
    %36 = vector.extract_strided_slice %32 {offsets = [1, 0], sizes = [15, 128], strides = [1, 1]} : vector<16x128xf32> to vector<15x128xf32>
    %c16_33 = arith.constant 16 : index
    %c256_34 = arith.constant 256 : index
    %37 = vector.load %arg5[%c16_33, %c256_34] : memref<32x384xf32, #tpu.memory_space<vmem>>, vector<15x128xf32>
    tpu.vector_store %arg5[%c16_33, %c256_34], %36 {strides = array<i32>} : memref<32x384xf32, #tpu.memory_space<vmem>>, vector<15x128xf32>,
    %c0_35 = arith.constant 0 : index
    %c0_36 = arith.constant 0 : index
    %38 = vector.load %arg5[%c0_35, %c0_36] : memref<32x384xf32, #tpu.memory_space<vmem>>, vector<32x384xf32>
    %c1_37 = arith.constant 1 : index
    %c0_38 = arith.constant 0 : index
    %c0_39 = arith.constant 0 : index
    %39 = vector.load %arg2[%c1_37, %c0_38, %c0_39] : memref<3x384x128xf32, #tpu.memory_space<vmem>>, vector<1x384x128xf32>
    %40 = vector.shape_cast %39 : vector<1x384x128xf32> to vector<384x128xf32>
    %cst_40 = arith.constant dense<0.000000e+00> : vector<32x128xf32>
    %41 = tpu.matmul %38, %40, %cst_40 {dimension_numbers = #tpu.dot_dimension_numbers<[1], [0], [0], [1], [0, 0, 1, 1], [], []>} : vector<32x384xf32>, vector<384x128xf32>, vector<32x128xf32> -> vector<32x128xf32>
    %c1_41 = arith.constant 1 : index
    %c0_42 = arith.constant 0 : index
    %c0_43 = arith.constant 0 : index
    %42 = vector.load %arg3[%c1_41, %c0_42, %c0_43] : memref<3x1x128xf32, #tpu.memory_space<vmem>>, vector<1x1x128xf32>
    %43 = vector.shape_cast %42 : vector<1x1x128xf32> to vector<1x128xf32>
    %44 = vector.broadcast %43 : vector<1x128xf32> to vector<32x128xf32>
    %45 = arith.addf %41, %44 : vector<32x128xf32>
    %46 = vector.extract_strided_slice %45 {offsets = [0, 0], sizes = [16, 128], strides = [1, 1]} : vector<32x128xf32> to vector<16x128xf32>
    %47 = vector.extract_strided_slice %46 {offsets = [0, 0], sizes = [15, 128], strides = [1, 1]} : vector<16x128xf32> to vector<15x128xf32>
    %c1_44 = arith.constant 1 : index
    %c0_45 = arith.constant 0 : index
    %48 = vector.load %arg5[%c1_44, %c0_45] : memref<32x384xf32, #tpu.memory_space<vmem>>, vector<15x128xf32>
    tpu.vector_store %arg5[%c1_44, %c0_45], %47 {strides = array<i32>} : memref<32x384xf32, #tpu.memory_space<vmem>>, vector<15x128xf32>,
    %c0_46 = arith.constant 0 : index
    %c128_47 = arith.constant 128 : index
    %49 = vector.load %arg5[%c0_46, %c128_47] : memref<32x384xf32, #tpu.memory_space<vmem>>, vector<16x128xf32>
    tpu.vector_store %arg5[%c0_46, %c128_47], %46 {strides = array<i32>} : memref<32x384xf32, #tpu.memory_space<vmem>>, vector<16x128xf32>,
    %50 = vector.extract_strided_slice %46 {offsets = [1, 0], sizes = [15, 128], strides = [1, 1]} : vector<16x128xf32> to vector<15x128xf32>
    %c0_48 = arith.constant 0 : index
    %c256_49 = arith.constant 256 : index
    %51 = vector.load %arg5[%c0_48, %c256_49] : memref<32x384xf32, #tpu.memory_space<vmem>>, vector<15x128xf32>
    tpu.vector_store %arg5[%c0_48, %c256_49], %50 {strides = array<i32>} : memref<32x384xf32, #tpu.memory_space<vmem>>, vector<15x128xf32>,
    %52 = vector.extract_strided_slice %45 {offsets = [16, 0], sizes = [16, 128], strides = [1, 1]} : vector<32x128xf32> to vector<16x128xf32>
    %53 = vector.extract_strided_slice %52 {offsets = [0, 0], sizes = [15, 128], strides = [1, 1]} : vector<16x128xf32> to vector<15x128xf32>
    %c17_50 = arith.constant 17 : index
    %c0_51 = arith.constant 0 : index
    %54 = vector.load %arg5[%c17_50, %c0_51] : memref<32x384xf32, #tpu.memory_space<vmem>>, vector<15x128xf32>
    tpu.vector_store %arg5[%c17_50, %c0_51], %53 {strides = array<i32>} : memref<32x384xf32, #tpu.memory_space<vmem>>, vector<15x128xf32>,
    %c16_52 = arith.constant 16 : index
    %c128_53 = arith.constant 128 : index
    %55 = vector.load %arg5[%c16_52, %c128_53] : memref<32x384xf32, #tpu.memory_space<vmem>>, vector<16x128xf32>
    tpu.vector_store %arg5[%c16_52, %c128_53], %52 {strides = array<i32>} : memref<32x384xf32, #tpu.memory_space<vmem>>, vector<16x128xf32>,
    %56 = vector.extract_strided_slice %52 {offsets = [1, 0], sizes = [15, 128], strides = [1, 1]} : vector<16x128xf32> to vector<15x128xf32>
    %c16_54 = arith.constant 16 : index
    %c256_55 = arith.constant 256 : index
    %57 = vector.load %arg5[%c16_54, %c256_55] : memref<32x384xf32, #tpu.memory_space<vmem>>, vector<15x128xf32>
    tpu.vector_store %arg5[%c16_54, %c256_55], %56 {strides = array<i32>} : memref<32x384xf32, #tpu.memory_space<vmem>>, vector<15x128xf32>,
    %c0_56 = arith.constant 0 : index
    %c0_57 = arith.constant 0 : index
    %58 = vector.load %arg5[%c0_56, %c0_57] : memref<32x384xf32, #tpu.memory_space<vmem>>, vector<32x384xf32>
    %c2 = arith.constant 2 : index
    %c0_58 = arith.constant 0 : index
    %c0_59 = arith.constant 0 : index
    %59 = vector.load %arg2[%c2, %c0_58, %c0_59] : memref<3x384x128xf32, #tpu.memory_space<vmem>>, vector<1x384x128xf32>
    %60 = vector.shape_cast %59 : vector<1x384x128xf32> to vector<384x128xf32>
    %cst_60 = arith.constant dense<0.000000e+00> : vector<32x128xf32>
    %61 = tpu.matmul %58, %60, %cst_60 {dimension_numbers = #tpu.dot_dimension_numbers<[1], [0], [0], [1], [0, 0, 1, 1], [], []>} : vector<32x384xf32>, vector<384x128xf32>, vector<32x128xf32> -> vector<32x128xf32>
    %c2_61 = arith.constant 2 : index
    %c0_62 = arith.constant 0 : index
    %c0_63 = arith.constant 0 : index
    %62 = vector.load %arg3[%c2_61, %c0_62, %c0_63] : memref<3x1x128xf32, #tpu.memory_space<vmem>>, vector<1x1x128xf32>
    %63 = vector.shape_cast %62 : vector<1x1x128xf32> to vector<1x128xf32>
    %64 = vector.broadcast %63 : vector<1x128xf32> to vector<32x128xf32>
    %65 = arith.addf %61, %64 : vector<32x128xf32>
    %c0_64 = arith.constant 0 : index
    %c0_65 = arith.constant 0 : index
    %66 = vector.load %arg4[%c0_64, %c0_65] : memref<32x128xf32, #tpu.memory_space<vmem>>, vector<32x128xf32>
    tpu.vector_store %arg4[%c0_64, %c0_65], %65 {strides = array<i32>} : memref<32x128xf32, #tpu.memory_space<vmem>>, vector<32x128xf32>,
    return
  }
  func.func @transform_0(%arg0: i32) -> (i32, i32) {
    %c0_i32 = arith.constant 0 : i32
    %c0_i32_0 = arith.constant 0 : i32
    return %arg0, %c0_i32 : i32, i32
  }
  func.func @transform_1(%arg0: i32) -> (i32, i32, i32) {
    %c0_i32 = arith.constant 0 : i32
    %c0_i32_0 = arith.constant 0 : i32
    %c0_i32_1 = arith.constant 0 : i32
    %c0_i32_2 = arith.constant 0 : i32
    return %c0_i32, %c0_i32_0, %c0_i32_1 : i32, i32, i32
  }
  func.func @transform_2(%arg0: i32) -> (i32, i32, i32) {
    %c0_i32 = arith.constant 0 : i32
    %c0_i32_0 = arith.constant 0 : i32
    %c0_i32_1 = arith.constant 0 : i32
    %c0_i32_2 = arith.constant 0 : i32
    return %c0_i32, %c0_i32_0, %c0_i32_1 : i32, i32, i32
  }
  func.func @transform_3(%arg0: i32) -> (i32, i32) {
    %c0_i32 = arith.constant 0 : i32
    %c0_i32_0 = arith.constant 0 : i32
    return %arg0, %c0_i32 : i32, i32
  }
}

</mosaic_0001>

<bundles_post_ra>
// kernel: searchable_layer_forward.1
= control target key start
LH: loop header
LB: loop body
LE: loop exit
PB: predicated region body
PF: predicated region fallthrough
CT: control target
= control target key end

     0   :  { %8 = vsyncpa [#allocation4], 0  ;;  %s697_s15 = smov [#allocation3]   ;;  %s698_s17 = smov 128   ;;  %s855_s0 = inlined_call_operand.vmem [shape: f32[32,128], index: 0, kind: input, shape index: {}]   ;;  %s856_s1 = inlined_call_operand.hbm [shape: f32[3,384,128], index: 1, kind: input, shape index: {}]   ;;  %s857_s2 = inlined_call_operand.vmem [shape: f32[3,1,128], index: 2, kind: input, shape index: {}]   ;;  %s858_s3 = inlined_call_operand.vmem [shape: f32[32,128], index: 3, kind: output, shape index: {}]  }
   0x1   :  { %s15_s14 = sshll.u32 %s856_s1, 4  ;;  %s17_s16 = sshll.u32 %s697_s15, 4  ;;  %s16_s14 = int_to_ptr.hbm [resolvable:$true] %s15_s14  ;;  %s18_s16 = int_to_ptr.vmem [resolvable:$true] %s17_s16 }
   0x2   :  { %s699_s18 = smov 8  }
   0x3   :  { %23 = dma.hbm_to_vmem [thread:$0]  %s16_s14, 18432, %s18_s16, [#allocation4], %s698_s17, %s698_s17, %s699_s18  }
   0x4   :  { %695 = dma.done.wait [#allocation4], 18432  }
   0x5   :  { %696 = vsyncadd [#allocation4], 4294948864  ;;  %v700_v0 = vmov 0.0   ;;  %v135_v1 = vld [vmem:[#allocation3 + $0x178] sm:$0xff]  ;;  %v134_v3 = vld [vmem:[#allocation3 + $0x170] sm:$0xff]  ;;  %vm50_vm0 = vcmask 1046528  }
   0x6   :  { %30 = vst [vmem:[#allocation2] sm:$0x1] %v700_v0  ;;  %v103_v2 = vld [vmem:[#allocation3 + $0x78] sm:$0xff]  ;;  %198 = vmatpush.msra.mxu2 %v135_v1  ;;  %v102_v4 = vld [vmem:[#allocation3 + $0x70] sm:$0xff]  ;;  %v133_v6 = vld [vmem:[#allocation3 + $0x168] sm:$0xff]  ;;  %vm40_vm1 = vcmask 1040384  }
   0x7   :  { %31 = vst [vmem:[#allocation2 + $0x2f] sm:$0x1] %v700_v0  ;;  %140 = vmatpush.msra.mxu0 %v103_v2  ;;  %v119_v5 = vld [vmem:[#allocation3 + $0xf8] sm:$0xff]  ;;  %v101_v7 = vld [vmem:[#allocation3 + $0x68] sm:$0xff]  ;;  %v118_v8 = vld [vmem:[#allocation3 + $0xf0] sm:$0xff] }
   0x8   :  { %32 = vst [vmem:[#allocation2 + $0x30] sm:$0x1] %v700_v0  ;;  %169 = vmatpush.msra.mxu1 %v119_v5  ;;  %199 = vmatpush.msra.mxu2 %v134_v3  ;;  %v117_v9 = vld [vmem:[#allocation3 + $0xe8] sm:$0xff]  ;;  %v132_v10 = vld [vmem:[#allocation3 + $0x160] sm:$0xff]  ;;  %v131_v13 = vld [vmem:[#allocation3 + $0x158] sm:$0xff] }
   0x9   :  { %33 = vst [vmem:[#allocation2 + $0x5f] sm:$0x1] %v700_v0  ;;  %141 = vmatpush.msra.mxu0 %v102_v4  ;;  %v100_v11 = vld [vmem:[#allocation3 + $0x60] sm:$0xff]  ;;  %v99_v14 = vld [vmem:[#allocation3 + $0x58] sm:$0xff]  ;;  %v130_v16 = vld [vmem:[#allocation3 + $0x150] sm:$0xff] }
   0xa   :  { %170 = vmatpush.msra.mxu1 %v118_v8  ;;  %200 = vmatpush.msra.mxu2 %v133_v6  ;;  %v116_v12 = vld [vmem:[#allocation3 + $0xe0] sm:$0xff]  ;;  %v115_v15 = vld [vmem:[#allocation3 + $0xd8] sm:$0xff]  ;;  %v98_v17 = vld [vmem:[#allocation3 + $0x50] sm:$0xff] }
   0xb   :  { %142 = vmatpush.msra.mxu0 %v101_v7  ;;  %v114_v18 = vld [vmem:[#allocation3 + $0xd0] sm:$0xff]  ;;  %v129_v19 = vld [vmem:[#allocation3 + $0x148] sm:$0xff]  ;;  %v128_v22 = vld [vmem:[#allocation3 + $0x140] sm:$0xff] }
   0xc   :  { %171 = vmatpush.msra.mxu1 %v117_v9  ;;  %201 = vmatpush.msra.mxu2 %v132_v10  ;;  %v97_v20 = vld [vmem:[#allocation3 + $0x48] sm:$0xff]  ;;  %v96_v23 = vld [vmem:[#allocation3 + $0x40] sm:$0xff]  ;;  %v127_v25 = vld [vmem:[#allocation3 + $0x138] sm:$0xff] }
   0xd   :  { %143 = vmatpush.msra.mxu0 %v100_v11  ;;  %v113_v21 = vld [vmem:[#allocation3 + $0xc8] sm:$0xff]  ;;  %v112_v24 = vld [vmem:[#allocation3 + $0xc0] sm:$0xff]  ;;  %v95_v26 = vld [vmem:[#allocation3 + $0x38] sm:$0xff] }
   0xe   :  { %172 = vmatpush.msra.mxu1 %v116_v12  ;;  %202 = vmatpush.msra.mxu2 %v131_v13  ;;  %v126_v27 = vld [vmem:[#allocation3 + $0x130] sm:$0xff]  ;;  %v111_v28 = vld [vmem:[#allocation3 + $0xb8] sm:$0xff]  ;;  %v727_v29 = vld [vmem:[%s855_s0] sm:$0xff] }
   0xf   :  { %144 = vmatpush.msra.mxu0 %v99_v14  ;;  %v732_v30 = vld [vmem:[%s855_s0 + $0x8] sm:$0xff]  ;;  %v94_v31 = vld [vmem:[#allocation3 + $0x30] sm:$0xff]  ;;  %v41_v35 = vrot.slane %v727_v29, 7  ;;  %v744_v37 = vld [vmem:[%s855_s0 + $0x18] sm:$0xff]  ;;  %v51_v51 = vrot.slane %v727_v29, 1 }
  0x10   :  { %173 = vmatpush.msra.mxu1 %v115_v15  ;;  %203 = vmatpush.msra.mxu2 %v130_v16  ;;  %v125_v32 = vld [vmem:[#allocation3 + $0x128] sm:$0xff]  ;;  %v110_v33 = vld [vmem:[#allocation3 + $0xb0] sm:$0xff]  ;;  %v52_v34 = vrot.slane %v732_v30, 1  ;;  %v70_v39 = vrot.slane %v744_v37, 1  ;;  %v124_v42 = vld [vmem:[#allocation3 + $0x120] sm:$0xff]  ;;  %v42_v2 = vrot.slane %v732_v30, 7 }
  0x11   :  { %145 = vmatpush.msra.mxu0 %v98_v17  ;;  %v739_v36 = vld [vmem:[%s855_s0 + $0x10] sm:$0xff]  ;;  %v93_v38 = vld [vmem:[#allocation3 + $0x28] sm:$0xff]  ;;  %46 = vst [vmem:[#allocation2] sm:$0xfe] %v41_v35  ;;  %v92_v43 = vld [vmem:[#allocation3 + $0x20] sm:$0xff] }
  0x12   :  { %174 = vmatpush.msra.mxu1 %v114_v18  ;;  %204 = vmatpush.msra.mxu2 %v129_v19  ;;  %57 = vst [vmem:[#allocation2 + $0x28] sm:$0x7f] %v52_v34  ;;  %v109_v40 = vld [vmem:[#allocation3 + $0xa8] sm:$0xff]  ;;  %v60_v41 = vrot.slane %v739_v36, 7  ;;  %v108_v44 = vld [vmem:[#allocation3 + $0xa0] sm:$0xff]  ;;  %v123_v45 = vld [vmem:[#allocation3 + $0x118] sm:$0xff]  ;;  %v53_v59 = vsel %vm50_vm0, %v51_v51, %v52_v34  ;;  %v43_v10 = vsel %vm40_vm1, %v41_v35, %v42_v2 }
  0x13   :  { %146 = vmatpush.msra.mxu0 %v97_v20  ;;  %75 = vst [vmem:[#allocation2 + $0x58] sm:$0x7f] %v70_v39  ;;  %v91_v46 = vld [vmem:[#allocation3 + $0x18] sm:$0xff]  ;;  %v122_v48 = vld [vmem:[#allocation3 + $0x110] sm:$0xff]  ;;  %v121_v52 = vld [vmem:[#allocation3 + $0x108] sm:$0xff]  ;;  %v69_v15 = vrot.slane %v739_v36, 1 }
  0x14   :  { %175 = vmatpush.msra.mxu1 %v113_v21  ;;  %205 = vmatpush.msra.mxu2 %v128_v22  ;;  %65 = vst [vmem:[#allocation2 + $0x30] sm:$0xfe] %v60_v41  ;;  %v107_v47 = vld [vmem:[#allocation3 + $0x98] sm:$0xff]  ;;  %v90_v49 = vld [vmem:[#allocation3 + $0x10] sm:$0xff]  ;;  %v89_v53 = vld [vmem:[#allocation3 + $0x8] sm:$0xff]  ;;  %v61_v20 = vrot.slane %v744_v37, 7 }
  0x15   :  { %147 = vmatpush.msra.mxu0 %v96_v23  ;;  %v106_v50 = vld [vmem:[#allocation3 + $0x90] sm:$0xff]  ;;  %v291_v54 = vld [vmem:[#allocation3 + $0x1f8] sm:$0xff]  ;;  %v105_v55 = vld [vmem:[#allocation3 + $0x88] sm:$0xff]  ;;  %v71_v18 = vsel %vm50_vm0, %v69_v15, %v70_v39 }
  0x16   :  { %176 = vmatpush.msra.mxu1 %v112_v24  ;;  %206 = vmatpush.msra.mxu2 %v127_v25  ;;  %v290_v56 = vld [vmem:[#allocation3 + $0x1f0] sm:$0xff]  ;;  %v120_v57 = vld [vmem:[#allocation3 + $0x100] sm:$0xff]  ;;  %v307_v62 = vld [vmem:[#allocation3 + $0x278] sm:$0xff]  ;;  %v62_v22 = vsel %vm40_vm1, %v60_v41, %v61_v20 }
  0x17   :  { %148 = vmatpush.msra.mxu0 %v95_v26  ;;  %v88_v58 = vld [vmem:[#allocation3] sm:$0xff]  ;;  %329 = vmatpush.msra.mxu3 %v291_v54  ;;  %v289_v63 = vld [vmem:[#allocation3 + $0x1e8] sm:$0xff]  ;;  %v306_v0 = vld [vmem:[#allocation3 + $0x270] sm:$0xff] }
  0x18   :  { %177 = vmatpush.msra.mxu1 %v111_v28  ;;  %207 = vmatpush.msra.mxu2 %v126_v27  ;;  %v76_v60 = vld [vmem:[#allocation2] sm:$0xff]  ;;  %v323_v1 = vld [vmem:[#allocation3 + $0x2f8] sm:$0xff]  ;;  %v305_v4 = vld [vmem:[#allocation3 + $0x268] sm:$0xff] }
  0x19   :  { %149 = vmatpush.msra.mxu0 %v94_v31  ;;  %v104_v61 = vld [vmem:[#allocation3 + $0x80] sm:$0xff]  ;;  %330 = vmatpush.msra.mxu3 %v290_v56  ;;  %v322_v5 = vld [vmem:[#allocation3 + $0x2f0] sm:$0xff]  ;;  %v287_v6 = vld [vmem:[#allocation3 + $0x1d8] sm:$0xff] }
  0x1a   :  { %178 = vmatpush.msra.mxu1 %v110_v33  ;;  %208 = vmatpush.msra.mxu2 %v125_v32  ;;  %v288_v3 = vld [vmem:[#allocation3 + $0x1e0] sm:$0xff]  ;;  %v321_v8 = vld [vmem:[#allocation3 + $0x2e8] sm:$0xff]  ;;  %v303_v11 = vld [vmem:[#allocation3 + $0x258] sm:$0xff] }
  0x1b   :  { %150 = vmatpush.msra.mxu0 %v93_v38  ;;  %331 = vmatpush.msra.mxu3 %v289_v63  ;;  %v304_v7 = vld [vmem:[#allocation3 + $0x260] sm:$0xff]  ;;  %v81_v9 = vld [vmem:[#allocation2 + $0x28] sm:$0xff]  ;;  %v286_v12 = vld [vmem:[#allocation3 + $0x1d0] sm:$0xff] }
  0x1c   :  { %179 = vmatpush.msra.mxu1 %v109_v40  ;;  %209 = vmatpush.msra.mxu2 %v124_v42  ;;  %v302_v13 = vld [vmem:[#allocation3 + $0x250] sm:$0xff]  ;;  %v285_v14 = vld [vmem:[#allocation3 + $0x1c8] sm:$0xff]  ;;  %v300_v17 = vld [vmem:[#allocation3 + $0x240] sm:$0xff] }
  0x1d   :  { %151 = vmatpush.msra.mxu0 %v92_v43  ;;  %332 = vmatpush.msra.mxu3 %v288_v3  ;;  %v301_v16 = vld [vmem:[#allocation3 + $0x248] sm:$0xff]  ;;  %v82_v19 = vld [vmem:[#allocation2 + $0x30] sm:$0xff]  ;;  %v87_v21 = vld [vmem:[#allocation2 + $0x58] sm:$0xff] }
  0x1e   :  { %180 = vmatpush.msra.mxu1 %v108_v44  ;;  %210 = vmatpush.msra.mxu2 %v123_v45  ;;  %v299_v23 = vld [vmem:[#allocation3 + $0x238] sm:$0xff]  ;;  %v320_v24 = vld [vmem:[#allocation3 + $0x2e0] sm:$0xff]  ;;  %v298_v25 = vld [vmem:[#allocation3 + $0x230] sm:$0xff] }
  0x1f   :  { %152 = vmatpush.msra.mxu0 %v91_v46  ;;  %333 = vmatpush.msra.mxu3 %v287_v6  ;;  %v319_v26 = vld [vmem:[#allocation3 + $0x2d8] sm:$0xff]  ;;  %v297_v27 = vld [vmem:[#allocation3 + $0x228] sm:$0xff]  ;;  %v318_v28 = vld [vmem:[#allocation3 + $0x2d0] sm:$0xff] }
  0x20   :  { %181 = vmatpush.msra.mxu1 %v107_v47  ;;  %211 = vmatpush.msra.mxu2 %v122_v48  ;;  %v284_v31 = vld [vmem:[#allocation3 + $0x1c0] sm:$0xff]  ;;  %v295_v32 = vld [vmem:[#allocation3 + $0x218] sm:$0xff]  ;;  %v294_v35 = vld [vmem:[#allocation3 + $0x210] sm:$0xff] }
  0x21   :  { %153 = vmatpush.msra.mxu0 %v90_v49  ;;  %334 = vmatpush.msra.mxu3 %v286_v12  ;;  %v316_v33 = vld [vmem:[#allocation3 + $0x2c0] sm:$0xff]  ;;  %v283_v34 = vld [vmem:[#allocation3 + $0x1b8] sm:$0xff]  ;;  %v293_v38 = vld [vmem:[#allocation3 + $0x208] sm:$0xff] }
  0x22   :  { %182 = vmatpush.msra.mxu1 %v106_v50  ;;  %212 = vmatpush.msra.mxu2 %v121_v52  ;;  %v314_v39 = vld [vmem:[#allocation3 + $0x2b0] sm:$0xff]  ;;  %v281_v40 = vld [vmem:[#allocation3 + $0x1a8] sm:$0xff]  ;;  %v292_v41 = vld [vmem:[#allocation3 + $0x200] sm:$0xff] }
  0x23   :  { %154 = vmatpush.msra.mxu0 %v89_v53  ;;  %335 = vmatpush.msra.mxu3 %v285_v14  ;;  %v313_v42 = vld [vmem:[#allocation3 + $0x2a8] sm:$0xff]  ;;  %v280_v43 = vld [vmem:[#allocation3 + $0x1a0] sm:$0xff]  ;;  %v279_v45 = vld [vmem:[#allocation3 + $0x198] sm:$0xff] }
  0x24   :  { %183 = vmatpush.msra.mxu1 %v105_v55  ;;  %213 = vmatpush.msra.mxu2 %v120_v57  ;;  %v312_v44 = vld [vmem:[#allocation3 + $0x2a0] sm:$0xff]  ;;  %v311_v46 = vld [vmem:[#allocation3 + $0x298] sm:$0xff]  ;;  %v278_v47 = vld [vmem:[#allocation3 + $0x190] sm:$0xff] }
  0x25   :  { %155 = vmatpush.msra.mxu0 %v88_v58  ;;  %214 = vmatmul.f32.vlgmr.msra.gmra.mxu2 %v53_v59  ;;  %v310_v48 = vld [vmem:[#allocation3 + $0x290] sm:$0xff]  ;;  %v277_v49 = vld [vmem:[#allocation3 + $0x188] sm:$0xff]  ;;  %v276_v51 = vld [vmem:[#allocation3 + $0x180] sm:$0xff] }
  0x26   :  { %156 = vmatmul.f32.vlgmr.msra.gmra.mxu0 %v76_v60  ;;  %184 = vmatpush.msra.mxu1 %v104_v61  ;;  %v309_v50 = vld [vmem:[#allocation3 + $0x288] sm:$0xff]  ;;  %v308_v52 = vld [vmem:[#allocation3 + $0x280] sm:$0xff]  ;;  %v480_v2 = vld [vmem:[#allocation3 + $0x378] sm:$0xff] }
  0x27   :  { %358 = vmatpush.msrb.mxu0 %v307_v62  ;;  %185 = vmatmul.f32.vlgmr.msra.gmra.mxu1 %v727_v29  ;;  %v296_v29 = vld [vmem:[#allocation3 + $0x220] sm:$0xff]  ;;  %v495_v3 = vld [vmem:[#allocation3 + $0x3f0] sm:$0xff]  ;;  %v494_v6 = vld [vmem:[#allocation3 + $0x3e8] sm:$0xff] }
  0x28   :  { %387 = vmatpush.msrb.mxu1 %v323_v1  ;;  %336 = vmatpush.msra.mxu3 %v284_v31  ;;  %v668_v53 = vld [vmem:[%s857_s2] ss:$0 sm:$0xff]  ;;  %v496_v1 = vld [vmem:[#allocation3 + $0x3f8] sm:$0xff] }
  0x29   :  { %359 = vmatpush.msrb.mxu0 %v306_v0  ;;  %518 = vmatpush.msrb.mxu2 %v480_v2  ;;  %v481_v2 = vld [vmem:[#allocation3 + $0x380] sm:$0xff] }
  0x2a   :  { %388 = vmatpush.msrb.mxu1 %v322_v5  ;;  %337 = vmatpush.msra.mxu3 %v283_v34 }
  0x2b   :  { %360 = vmatpush.msrb.mxu0 %v305_v4  ;;  %v479_v4 = vld [vmem:[#allocation3 + $0x370] sm:$0xff] }
  0x2c   :  { %389 = vmatpush.msrb.mxu1 %v321_v8  ;;  %519 = vmatpush.msrb.mxu2 %v479_v4  ;;  %v478_v8 = vld [vmem:[#allocation3 + $0x368] sm:$0xff] }
  0x2d   :  { %361 = vmatpush.msrb.mxu0 %v304_v7  ;;  %217 = vmatmul.f32.gmra.mxu2 %v81_v9  ;;  %v502_v4 = vld [vmem:[#allocation3 + $0x428] sm:$0xff] }
  0x2e   :  { %159 = vmatmul.f32.gmra.mxu0 %v43_v10  ;;  %390 = vmatpush.msrb.mxu1 %v320_v24 }
  0x2f   :  { %362 = vmatpush.msrb.mxu0 %v303_v11  ;;  %188 = vmatmul.f32.gmra.mxu1 %v732_v30  ;;  %v317_v30 = vld [vmem:[#allocation3 + $0x2c8] sm:$0xff] }
  0x30   :  { %391 = vmatpush.msrb.mxu1 %v319_v26  ;;  %520 = vmatpush.msrb.mxu2 %v478_v8  ;;  %v467_v8 = vld [vmem:[#allocation3 + $0x310] sm:$0xff] }
  0x31   :  { %363 = vmatpush.msrb.mxu0 %v302_v13  ;;  %v493_v13 = vld [vmem:[#allocation3 + $0x3e0] sm:$0xff] }
  0x32   :  { %392 = vmatpush.msrb.mxu1 %v318_v28 }
  0x33   :  { %364 = vmatpush.msrb.mxu0 %v301_v16 }
  0x34   :  { %393 = vmatpush.msrb.mxu1 %v317_v30 }
  0x35   :  { %365 = vmatpush.msrb.mxu0 %v300_v17  ;;  %220 = vmatmul.f32.gmra.mxu2 %v71_v18 }
  0x36   :  { %162 = vmatmul.f32.gmra.mxu0 %v82_v19  ;;  %394 = vmatpush.msrb.mxu1 %v316_v33 }
  0x37   :  { %191 = vmatmul.f32.gmra.mxu1 %v739_v36  ;;  %366 = vmatpush.msrb.mxu0 %v299_v23  ;;  %v315_v36 = vld [vmem:[#allocation3 + $0x2b8] sm:$0xff] }
  0x38   :  { %395 = vmatpush.msrb.mxu1 %v315_v36 }
  0x39   :  { %367 = vmatpush.msrb.mxu0 %v298_v25 }
  0x3a   :  { %396 = vmatpush.msrb.mxu1 %v314_v39  ;;  %v476_v39 = vld [vmem:[#allocation3 + $0x358] sm:$0xff] }
  0x3b   :  { %368 = vmatpush.msrb.mxu0 %v297_v27 }
  0x3c   :  { %397 = vmatpush.msrb.mxu1 %v313_v42  ;;  %v490_v42 = vld [vmem:[#allocation3 + $0x3c8] sm:$0xff] }
  0x3d   :  { %223 = vmatmul.f32.gmra.mxu2 %v87_v21  ;;  %369 = vmatpush.msrb.mxu0 %v296_v29 }
  0x3e   :  { %165 = vmatmul.f32.gmra.mxu0 %v62_v22  ;;  %398 = vmatpush.msrb.mxu1 %v312_v44  ;;  %v782_v44 = vld [vmem:[#allocation3 + $0x470] sm:$0xff] }
  0x3f   :  { %194 = vmatmul.f32.gmra.mxu1 %v744_v37  ;;  %370 = vmatpush.msrb.mxu0 %v295_v32  ;;  %v282_v37 = vld [vmem:[#allocation3 + $0x1b0] sm:$0xff] }
  0x40   :  { %338 = vmatpush.msra.mxu3 %v282_v37  ;;  %399 = vmatpush.msrb.mxu1 %v311_v46  ;;  %v492_v37 = vld [vmem:[#allocation3 + $0x3d8] sm:$0xff]  ;;  %v474_v46 = vld [vmem:[#allocation3 + $0x348] sm:$0xff] }
  0x41   :  { %371 = vmatpush.msrb.mxu0 %v294_v35 }
  0x42   :  { %339 = vmatpush.msra.mxu3 %v281_v40  ;;  %400 = vmatpush.msrb.mxu1 %v310_v48  ;;  %v491_v40 = vld [vmem:[#allocation3 + $0x3d0] sm:$0xff]  ;;  %v488_v48 = vld [vmem:[#allocation3 + $0x3b8] sm:$0xff] }
  0x43   :  { %372 = vmatpush.msrb.mxu0 %v293_v38  ;;  %v477_v38 = vld [vmem:[#allocation3 + $0x360] sm:$0xff] }
  0x44   :  { %340 = vmatpush.msra.mxu3 %v280_v43  ;;  %401 = vmatpush.msrb.mxu1 %v309_v50  ;;  %v475_v43 = vld [vmem:[#allocation3 + $0x350] sm:$0xff] }
  0x45   :  { %373 = vmatpush.msrb.mxu0 %v292_v41  ;;  %521 = vmatpush.msrb.mxu2 %v477_v38  ;;  %v779_v41 = vld [vmem:[#allocation3 + $0x478] sm:$0xff]  ;;  %v487_v50 = vld [vmem:[#allocation3 + $0x3b0] sm:$0xff] }
  0x46   :  { %341 = vmatpush.msra.mxu3 %v279_v45  ;;  %402 = vmatpush.msrb.mxu1 %v308_v52  ;;  %v489_v45 = vld [vmem:[#allocation3 + $0x3c0] sm:$0xff]  ;;  %v486_v52 = vld [vmem:[#allocation3 + $0x3a8] sm:$0xff] }
  0x47   :  { %522 = vmatpush.msrb.mxu2 %v476_v39  ;;  %576 = vmatpush.msra.mxu0 %v779_v41 }
  0x48   :  { %342 = vmatpush.msra.mxu3 %v278_v47  ;;  %616 = vmatpush.msra.mxu1 %v779_v41  ;;  %v786_v47 = vld [vmem:[#allocation3 + $0x468] sm:$0xff] }
  0x49   :  { %523 = vmatpush.msrb.mxu2 %v475_v43  ;;  %577 = vmatpush.msra.mxu0 %v782_v44 }
  0x4a   :  { %343 = vmatpush.msra.mxu3 %v277_v49  ;;  %619 = vmatpush.msra.mxu1 %v782_v44  ;;  %v791_v49 = vld [vmem:[#allocation3 + $0x460] sm:$0xff] }
  0x4b   :  { %524 = vmatpush.msrb.mxu2 %v474_v46  ;;  %578 = vmatpush.msra.mxu0 %v786_v47 }
  0x4c   :  { %344 = vmatpush.msra.mxu3 %v276_v51  ;;  %622 = vmatpush.msra.mxu1 %v786_v47  ;;  %v795_v51 = vld [vmem:[#allocation3 + $0x458] sm:$0xff] }
  0x4d   :  { %579 = vmatpush.msra.mxu0 %v791_v49 }
  0x4e   :  { %547 = vmatpush.msrb.mxu3 %v496_v1  ;;  %625 = vmatpush.msra.mxu1 %v791_v49  ;;  %v503_v1 = vld [vmem:[#allocation3 + $0x430] sm:$0xff] }
  0x4f   :  { %580 = vmatpush.msra.mxu0 %v795_v51 }
  0x50   :  { %548 = vmatpush.msrb.mxu3 %v495_v3  ;;  %628 = vmatpush.msra.mxu1 %v795_v51  ;;  %v469_v3 = vld [vmem:[#allocation3 + $0x320] sm:$0xff] }
  0x52   :  { %549 = vmatpush.msrb.mxu3 %v494_v6  ;;  %v501_v6 = vld [vmem:[#allocation3 + $0x420] sm:$0xff] }
  0x54   :  { %550 = vmatpush.msrb.mxu3 %v493_v13  ;;  %v497_v13 = vld [vmem:[#allocation3 + $0x400] sm:$0xff] }
  0x56   :  { %551 = vmatpush.msrb.mxu3 %v492_v37 }
  0x58   :  { %552 = vmatpush.msrb.mxu3 %v491_v40 }
  0x5a   :  { %553 = vmatpush.msrb.mxu3 %v490_v42 }
  0x5c   :  { %554 = vmatpush.msrb.mxu3 %v489_v45 }
  0x5e   :  { %555 = vmatpush.msrb.mxu3 %v488_v48 }
  0x60   :  { %556 = vmatpush.msrb.mxu3 %v487_v50 }
  0x62   :  { %557 = vmatpush.msrb.mxu3 %v486_v52 }
  0xa3   :  { %v157_v54 = vpop.f32.mrf.mxu0 }
  0xa4   :  { %v158_v55 = vadd.f32 %v668_v53, %v157_v54  ;;  %v186_v56 = vpop.f32.mrf.mxu1  ;;  %v485_v54 = vld [vmem:[#allocation3 + $0x3a0] sm:$0xff] }
  0xa5   :  { %558 = vmatpush.msrb.mxu3 %v485_v54 }
  0xa6   :  { %v187_v57 = vadd.f32 %v186_v56, %v158_v55  ;;  %v803_v55 = vld [vmem:[#allocation3 + $0x448] sm:$0xff]  ;;  %v473_v56 = vld [vmem:[#allocation3 + $0x340] sm:$0xff] }
  0xa7   :  { %525 = vmatpush.msrb.mxu2 %v473_v56  ;;  %v670_v56 = vld [vmem:[%s857_s2 + $0x2] ss:$0 sm:$0xff] }
  0xa8   :  { %v215_v58 = vpop.f32.mrf.mxu2 }
  0xa9   :  { %v216_v59 = vadd.f32 %v215_v58, %v187_v57  ;;  %v484_v57 = vld [vmem:[#allocation3 + $0x398] sm:$0xff]  ;;  %v807_v58 = vld [vmem:[#allocation3 + $0x440] sm:$0xff] }
  0xaa   :  { %559 = vmatpush.msrb.mxu3 %v484_v57 }
  0xab   :  { %v160_v60 = vpop.f32.mrf.mxu0  ;;  %v229_v61 = vrot.slane %v216_v59, 7  ;;  %374 = vmatmul.f32.vlgmr.msrb.gmra.mxu0 %v216_v59  ;;  %v238_v10 = vrot.slane %v216_v59, 1  ;;  %v472_v59 = vld [vmem:[#allocation3 + $0x338] sm:$0xff] }
  0xac   :  { %v161_v62 = vadd.f32 %v668_v53, %v160_v60  ;;  %v189_v63 = vpop.f32.mrf.mxu1  ;;  %v483_v60 = vld [vmem:[#allocation3 + $0x390] sm:$0xff]  ;;  %526 = vmatpush.msrb.mxu2 %v472_v59 }
  0xad   :  { %234 = vst [vmem:[#allocation2] sm:$0xfe] %v229_v61  ;;  %560 = vmatpush.msrb.mxu3 %v483_v60 }
  0xae   :  { %v190_v0 = vadd.f32 %v189_v63, %v161_v62  ;;  %v811_v62 = vld [vmem:[#allocation3 + $0x438] sm:$0xff]  ;;  %v482_v63 = vld [vmem:[#allocation3 + $0x388] sm:$0xff] }
  0xaf   :  { %561 = vmatpush.msrb.mxu3 %v482_v63 }
  0xb0   :  { %v218_v5 = vpop.f32.mrf.mxu2 }
  0xb1   :  { %v219_v7 = vadd.f32 %v218_v5, %v190_v0  ;;  %v470_v0 = vld [vmem:[#allocation3 + $0x328] sm:$0xff]  ;;  %562 = vmatpush.msrb.mxu3 %v481_v2  ;;  %v468_v5 = vld [vmem:[#allocation3 + $0x318] sm:$0xff] }
  0xb3   :  { %v163_v9 = vpop.f32.mrf.mxu0  ;;  %v239_v11 = vrot.slane %v219_v7, 1  ;;  %377 = vmatmul.f32.gmra.mxu0 %v219_v7  ;;  %v230_v18 = vrot.slane %v219_v7, 7  ;;  %v500_v7 = vld [vmem:[#allocation3 + $0x418] sm:$0xff] }
  0xb4   :  { %v164_v12 = vadd.f32 %v668_v53, %v163_v9  ;;  %v263_v14 = vld [vmem:[#allocation2] sm:$0xff]  ;;  %v192_v15 = vpop.f32.mrf.mxu1  ;;  %v499_v9 = vld [vmem:[#allocation3 + $0x410] sm:$0xff] }
  0xb5   :  { %v240_v16 = vsel %vm50_vm0, %v238_v10, %v239_v11  ;;  %244 = vst [vmem:[#allocation2 + $0x28] sm:$0x7f] %v239_v11  ;;  %345 = vmatmul.f32.vlgmr.msra.gmra.mxu3 %v263_v14  ;;  %v231_v24 = vsel %vm40_vm1, %v229_v61, %v230_v18  ;;  %v471_v61 = vld [vmem:[#allocation3 + $0x330] sm:$0xff]  ;;  %v466_v10 = vld [vmem:[#allocation3 + $0x308] sm:$0xff] }
  0xb6   :  { %v193_v17 = vadd.f32 %v192_v15, %v164_v12  ;;  %403 = vmatmul.f32.vlgmr.msrb.gmra.mxu1 %v240_v16  ;;  %527 = vmatpush.msrb.mxu2 %v471_v61  ;;  %v498_v11 = vld [vmem:[#allocation3 + $0x408] sm:$0xff]  ;;  %v465_v12 = vld [vmem:[#allocation3 + $0x300] sm:$0xff] }
  0xb7   :  { %618 = vmatpush.msra.mxu3 %v779_v41  ;;  %v669_v15 = vld [vmem:[%s857_s2 + $0x1] ss:$0 sm:$0xff] }
  0xb8   :  { %v221_v19 = vpop.f32.mrf.mxu2  ;;  %528 = vmatpush.msrb.mxu2 %v470_v0 }
  0xb9   :  { %v222_v20 = vadd.f32 %v221_v19, %v193_v17  ;;  %621 = vmatpush.msra.mxu3 %v782_v44 }
  0xba   :  { %529 = vmatpush.msrb.mxu2 %v469_v3 }
  0xbb   :  { %v166_v21 = vpop.f32.mrf.mxu0  ;;  %v247_v22 = vrot.slane %v222_v20, 7  ;;  %380 = vmatmul.f32.gmra.mxu0 %v222_v20  ;;  %v256_v30 = vrot.slane %v222_v20, 1  ;;  %624 = vmatpush.msra.mxu3 %v786_v47 }
  0xbc   :  { %v167_v23 = vadd.f32 %v668_v53, %v166_v21  ;;  %v195_v25 = vpop.f32.mrf.mxu1  ;;  %v268_v26 = vld [vmem:[#allocation2 + $0x28] sm:$0xff]  ;;  %v799_v53 = vld [vmem:[#allocation3 + $0x450] sm:$0xff]  ;;  %530 = vmatpush.msrb.mxu2 %v468_v5 }
  0xbd   :  { %252 = vst [vmem:[#allocation2 + $0x30] sm:$0xfe] %v247_v22  ;;  %348 = vmatmul.f32.gmra.mxu3 %v231_v24  ;;  %631 = vmatpush.msra.mxu1 %v799_v53 }
  0xbe   :  { %v196_v27 = vadd.f32 %v195_v25, %v167_v23  ;;  %406 = vmatmul.f32.gmra.mxu1 %v268_v26  ;;  %581 = vmatpush.msra.mxu0 %v799_v53 }
  0xbf   :  { %634 = vmatpush.msra.mxu1 %v803_v55  ;;  %531 = vmatpush.msrb.mxu2 %v467_v8 }
  0xc0   :  { %v224_v28 = vpop.f32.mrf.mxu2  ;;  %582 = vmatpush.msra.mxu0 %v803_v55  ;;  %627 = vmatpush.msra.mxu3 %v791_v49 }
  0xc1   :  { %v225_v29 = vadd.f32 %v224_v28, %v196_v27  ;;  %637 = vmatpush.msra.mxu1 %v807_v58  ;;  %532 = vmatpush.msrb.mxu2 %v466_v10 }
  0xc2   :  { %583 = vmatpush.msra.mxu0 %v807_v58  ;;  %630 = vmatpush.msra.mxu3 %v795_v51 }
  0xc3   :  { %v257_v31 = vrot.slane %v225_v29, 1  ;;  %383 = vmatmul.f32.gmra.mxu0 %v225_v29  ;;  %v248_v34 = vrot.slane %v225_v29, 7  ;;  %640 = vmatpush.msra.mxu1 %v811_v62 }
  0xc4   :  { %v269_v32 = vld [vmem:[#allocation2 + $0x30] sm:$0xff]  ;;  %584 = vmatpush.msra.mxu0 %v811_v62  ;;  %533 = vmatpush.msrb.mxu2 %v465_v12 }
  0xc5   :  { %v258_v33 = vsel %vm50_vm0, %v256_v30, %v257_v31  ;;  %262 = vst [vmem:[#allocation2 + $0x58] sm:$0x7f] %v257_v31  ;;  %351 = vmatmul.f32.gmra.mxu3 %v269_v32  ;;  %v249_v35 = vsel %vm40_vm1, %v247_v22, %v248_v34  ;;  %643 = vmatpush.msra.mxu1 %v503_v1 }
  0xc6   :  { %409 = vmatmul.f32.gmra.mxu1 %v258_v33  ;;  %585 = vmatpush.msra.mxu0 %v503_v1 }
  0xc7   :  { %646 = vmatpush.msra.mxu1 %v502_v4  ;;  %617 = vmatpush.msra.mxu2 %v779_v41 }
  0xc8   :  { %586 = vmatpush.msra.mxu0 %v502_v4  ;;  %633 = vmatpush.msra.mxu3 %v799_v53 }
  0xc9   :  { %649 = vmatpush.msra.mxu1 %v501_v6  ;;  %620 = vmatpush.msra.mxu2 %v782_v44 }
  0xca   :  { %587 = vmatpush.msra.mxu0 %v501_v6  ;;  %636 = vmatpush.msra.mxu3 %v803_v55 }
  0xcb   :  { %652 = vmatpush.msra.mxu1 %v500_v7  ;;  %623 = vmatpush.msra.mxu2 %v786_v47 }
  0xcc   :  { %v274_v36 = vld [vmem:[#allocation2 + $0x58] sm:$0xff]  ;;  %588 = vmatpush.msra.mxu0 %v500_v7  ;;  %639 = vmatpush.msra.mxu3 %v807_v58 }
  0xcd   :  { %354 = vmatmul.f32.gmra.mxu3 %v249_v35  ;;  %655 = vmatpush.msra.mxu1 %v499_v9 }
  0xce   :  { %412 = vmatmul.f32.gmra.mxu1 %v274_v36  ;;  %589 = vmatpush.msra.mxu0 %v499_v9 }
  0xcf   :  { %658 = vmatpush.msra.mxu1 %v498_v11  ;;  %626 = vmatpush.msra.mxu2 %v791_v49 }
  0xd0   :  { %590 = vmatpush.msra.mxu0 %v498_v11  ;;  %642 = vmatpush.msra.mxu3 %v811_v62 }
  0xd1   :  { %661 = vmatpush.msra.mxu1 %v497_v13  ;;  %629 = vmatpush.msra.mxu2 %v795_v51 }
  0xd2   :  { %591 = vmatpush.msra.mxu0 %v497_v13  ;;  %645 = vmatpush.msra.mxu3 %v503_v1 }
  0xd3   :  { %632 = vmatpush.msra.mxu2 %v799_v53 }
  0xd4   :  { %648 = vmatpush.msra.mxu3 %v502_v4 }
  0xd5   :  { %635 = vmatpush.msra.mxu2 %v803_v55 }
  0xd6   :  { %651 = vmatpush.msra.mxu3 %v501_v6 }
  0xd7   :  { %638 = vmatpush.msra.mxu2 %v807_v58 }
  0xd8   :  { %654 = vmatpush.msra.mxu3 %v500_v7 }
  0xd9   :  { %641 = vmatpush.msra.mxu2 %v811_v62 }
  0xda   :  { %657 = vmatpush.msra.mxu3 %v499_v9 }
  0xdb   :  { %644 = vmatpush.msra.mxu2 %v503_v1 }
  0xdc   :  { %660 = vmatpush.msra.mxu3 %v498_v11 }
  0xdd   :  { %647 = vmatpush.msra.mxu2 %v502_v4 }
  0xde   :  { %663 = vmatpush.msra.mxu3 %v497_v13 }
  0xdf   :  { %650 = vmatpush.msra.mxu2 %v501_v6 }
  0xe1   :  { %653 = vmatpush.msra.mxu2 %v500_v7 }
  0xe3   :  { %656 = vmatpush.msra.mxu2 %v499_v9 }
  0xe5   :  { %659 = vmatpush.msra.mxu2 %v498_v11 }
  0xe7   :  { %662 = vmatpush.msra.mxu2 %v497_v13 }
 0x128   :  { %v375_v14 = vpop.f32.mrf.mxu0 }
 0x130   :  { %v378_v21 = vpop.f32.mrf.mxu0 }
 0x133   :  { %v404_v16 = vpop.f32.mrf.mxu1 }
 0x138   :  { %v346_v17 = vpop.f32.mrf.mxu3  ;;  %v381_v36 = vpop.f32.mrf.mxu0 }
 0x139   :  { %v347_v18 = vadd.f32 %v669_v15, %v346_v17 }
 0x13b   :  { %v376_v19 = vadd.f32 %v375_v14, %v347_v18  ;;  %v407_v24 = vpop.f32.mrf.mxu1 }
 0x13d   :  { %v405_v20 = vadd.f32 %v404_v16, %v376_v19 }
 0x13f   :  { %v418_v22 = vrot.slane %v405_v20, 7  ;;  %563 = vmatmul.f32.vlgmr.msrb.gmra.mxu3 %v405_v20  ;;  %v427_v28 = vrot.slane %v405_v20, 1 }
 0x140   :  { %v349_v23 = vpop.f32.mrf.mxu3  ;;  %v384_v44 = vpop.f32.mrf.mxu0 }
 0x141   :  { %423 = vst [vmem:[#allocation2] sm:$0xfe] %v418_v22  ;;  %v350_v25 = vadd.f32 %v669_v15, %v349_v23 }
 0x143   :  { %v379_v26 = vadd.f32 %v378_v21, %v350_v25  ;;  %v410_v37 = vpop.f32.mrf.mxu1 }
 0x145   :  { %v408_v27 = vadd.f32 %v407_v24, %v379_v26 }
 0x147   :  { %v419_v29 = vrot.slane %v408_v27, 7  ;;  %v428_v30 = vrot.slane %v408_v27, 1  ;;  %566 = vmatmul.f32.gmra.mxu3 %v408_v27 }
 0x148   :  { %v352_v31 = vpop.f32.mrf.mxu3  ;;  %v452_v32 = vld [vmem:[#allocation2] sm:$0xff] }
 0x149   :  { %v420_v33 = vsel %vm40_vm1, %v418_v22, %v419_v29  ;;  %v429_v34 = vsel %vm50_vm0, %v427_v28, %v428_v30  ;;  %433 = vst [vmem:[#allocation2 + $0x28] sm:$0x7f] %v428_v30  ;;  %v353_v35 = vadd.f32 %v669_v15, %v352_v31  ;;  %534 = vmatmul.f32.vlgmr.msrb.gmra.mxu2 %v452_v32 }
 0x14a   :  { %592 = vmatmul.f32.vlgmr.msra.gmra.mxu0 %v429_v34 }
 0x14b   :  { %v382_v38 = vadd.f32 %v381_v36, %v353_v35  ;;  %v413_v45 = vpop.f32.mrf.mxu1 }
 0x14d   :  { %v411_v39 = vadd.f32 %v410_v37, %v382_v38 }
 0x14f   :  { %v436_v40 = vrot.slane %v411_v39, 7  ;;  %569 = vmatmul.f32.gmra.mxu3 %v411_v39  ;;  %v445_v48 = vrot.slane %v411_v39, 1 }
 0x150   :  { %v355_v41 = vpop.f32.mrf.mxu3  ;;  %v457_v42 = vld [vmem:[#allocation2 + $0x28] sm:$0xff] }
 0x151   :  { %441 = vst [vmem:[#allocation2 + $0x30] sm:$0xfe] %v436_v40  ;;  %v356_v43 = vadd.f32 %v669_v15, %v355_v41  ;;  %595 = vmatmul.f32.vlgmr.msra.gmra.mxu1 %v457_v42  ;;  %537 = vmatmul.f32.gmra.mxu2 %v420_v33 }
 0x153   :  { %v385_v46 = vadd.f32 %v384_v44, %v356_v43 }
 0x155   :  { %v414_v47 = vadd.f32 %v413_v45, %v385_v46 }
 0x157   :  { %v437_v49 = vrot.slane %v414_v47, 7  ;;  %v446_v50 = vrot.slane %v414_v47, 1  ;;  %572 = vmatmul.f32.gmra.mxu3 %v414_v47 }
 0x158   :  { %v458_v51 = vld [vmem:[#allocation2 + $0x30] sm:$0xff] }
 0x159   :  { %v438_v52 = vsel %vm40_vm1, %v436_v40, %v437_v49  ;;  %v447_v53 = vsel %vm50_vm0, %v445_v48, %v446_v50  ;;  %451 = vst [vmem:[#allocation2 + $0x58] sm:$0x7f] %v446_v50  ;;  %540 = vmatmul.f32.gmra.mxu2 %v458_v51 }
 0x160   :  { %v463_v54 = vld [vmem:[#allocation2 + $0x58] sm:$0xff] }
 0x161   :  { %543 = vmatmul.f32.gmra.mxu2 %v438_v52  ;;  %601 = vmatmul.f32.vlgmr.msra.gmra.mxu3 %v463_v54 }
 0x169   :  { %598 = vmatmul.f32.vlgmr.msra.gmra.mxu2 %v447_v53 }
 0x1c2   :  { %v564_v55 = vpop.f32.mrf.mxu3 }
 0x1c7   :  { %v593_v61 = vpop.f32.mrf.mxu0 }
 0x1ca   :  { %v567_v58 = vpop.f32.mrf.mxu3 }
 0x1cc   :  { %v535_v57 = vpop.f32.mrf.mxu2 }
 0x1cd   :  { %v536_v59 = vadd.f32 %v670_v56, %v535_v57 }
 0x1ce   :  { %v596_v3 = vpop.f32.mrf.mxu1 }
 0x1cf   :  { %v565_v60 = vadd.f32 %v564_v55, %v536_v59 }
 0x1d1   :  { %v594_v62 = vadd.f32 %v593_v61, %v565_v60 }
 0x1d2   :  { %v570_v1 = vpop.f32.mrf.mxu3 }
 0x1d3   :  { %605 = vst [vmem:[%s858_s3] sm:$0xff] %v594_v62 }
 0x1d4   :  { %v538_v63 = vpop.f32.mrf.mxu2 }
 0x1d5   :  { %v539_v0 = vadd.f32 %v670_v56, %v538_v63 }
 0x1d7   :  { %v568_v2 = vadd.f32 %v567_v58, %v539_v0 }
 0x1d9   :  { %v597_v4 = vadd.f32 %v596_v3, %v568_v2 }
 0x1da   :  { %v573_v6 = vpop.f32.mrf.mxu3 }
 0x1db   :  { %606 = vst [vmem:[%s858_s3 + $0x8] sm:$0xff] %v597_v4 }
 0x1dc   :  { %v541_v5 = vpop.f32.mrf.mxu2 }
 0x1dd   :  { %v542_v9 = vadd.f32 %v670_v56, %v541_v5 }
 0x1df   :  { %v571_v13 = vadd.f32 %v570_v1, %v542_v9 }
 0x1e4   :  { %v544_v7 = vpop.f32.mrf.mxu2  ;;  %v602_v11 = vpop.f32.mrf.mxu3 }
 0x1e5   :  { %v545_v8 = vadd.f32 %v670_v56, %v544_v7 }
 0x1e7   :  { %v574_v10 = vadd.f32 %v573_v6, %v545_v8 }
 0x1e9   :  { %v603_v12 = vadd.f32 %v602_v11, %v574_v10 }
 0x1eb   :  { %608 = vst [vmem:[%s858_s3 + $0x18] sm:$0xff] %v603_v12 }
 0x1ec   :  { %v599_v14 = vpop.f32.mrf.mxu2 }
 0x1ed   :  { %v600_v15 = vadd.f32 %v599_v14, %v571_v13 }
 0x1ef   :  { %607 = vst [vmem:[%s858_s3 + $0x10] sm:$0xff] %v600_v15 }
 0x1f0   :  { %613 = vsyncpa [#allocation4], 1 }

</bundles_post_ra>
